<compile_context>
chip_gen: v7x
topology: tpu7x:2x2x1
jax: 0.10.0
libtpu: 0.0.40
codegen_flags: <defaults>
</compile_context>

<pallas_src>
import jax
import jax.numpy as jnp
from jax.experimental import pallas as pl
from jax.experimental.pallas import tpu as pltpu


def _hardswish(x):
    # relu6(x + 3) / 6 * x
    return jnp.clip(x + 3.0, 0.0, 6.0) * (1.0 / 6.0) * x


def q_network_kernel(s_ref,
                     w0_ref, b0_ref,
                     w1_ref, b1_ref,
                     w2_ref, b2_ref,
                     w3_ref, b3_ref,
                     q_ref):
    # net[0:2]: h1 = relu(s @ W0 + b0)                      -> (TILE_B, mid)
    h1 = jnp.dot(s_ref[...], w0_ref[...],
                 preferred_element_type=jnp.float32) + b0_ref[...]
    h1 = jnp.maximum(h1, 0.0)

    # DenseNet.dense1: d1 = hardswish(h1 @ W1 + b1)         -> (TILE_B, mid)
    z1 = jnp.dot(h1, w1_ref[...],
                 preferred_element_type=jnp.float32) + b1_ref[...]
    d1 = _hardswish(z1)
    x2 = jnp.concatenate([h1, d1], axis=1)                  # (TILE_B, 2*mid)

    # DenseNet.dense2: d2 = hardswish(x2 @ W2 + b2)         -> (TILE_B, 2*mid)
    z2 = jnp.dot(x2, w2_ref[...],
                 preferred_element_type=jnp.float32) + b2_ref[...]
    d2 = _hardswish(z2)
    x3 = jnp.concatenate([x2, d2], axis=1)                  # (TILE_B, 4*mid)

    # Spectral-normalized output head (weight pre-normalized and lane-padded).
    q = jnp.dot(x3, w3_ref[...],
                preferred_element_type=jnp.float32) + b3_ref[...]
    q_ref[...] = q.astype(q_ref.dtype)


def _round_up(x, m):
    return ((x + m - 1) // m) * m


def spectral_normalize(w, n_iters=30, eps=1e-12):
    """Effective weight of nn.utils.spectral_norm: W / sigma_max(W)."""
    v = jnp.full((w.shape[1],), 1.0 / jnp.sqrt(w.shape[1]), w.dtype)
    u = jnp.zeros((w.shape[0],), w.dtype)
    for _ in range(n_iters):
        u = w @ v
        u = u / (jnp.linalg.norm(u) + eps)
        v = w.T @ u
        v = v / (jnp.linalg.norm(v) + eps)
    sigma = jnp.dot(u, w @ v)
    return w / sigma


def q_network_forward(s, params, *, noise_std=0.0, key=None, tile_b=128):
    w0, b0 = params["w0"], params["b0"]
    w1, b1 = params["w1"], params["b1"]
    w2, b2 = params["w2"], params["b2"]
    w3, b3 = params["w3"], params["b3"]

    B, state_dim = s.shape
    mid = w0.shape[1]
    action_dim = w3.shape[1]

    # Spectral norm of the output head (weight only, bias untouched).
    w3_sn = spectral_normalize(w3)

    # Lane-dense output head: pad action_dim up to a multiple of 128 so the
    # final store is an unmasked full-width slab; slice back afterwards.
    out_pad = _round_up(action_dim, 128)
    w3_p = jnp.pad(w3_sn, ((0, 0), (0, out_pad - action_dim)))
    b3_p = jnp.pad(b3, (0, out_pad - action_dim)).reshape(1, out_pad)

    # Biases as (1, dim) 2-D arrays for TPU-friendly broadcasting.
    b0_2d = b0.reshape(1, -1)
    b1_2d = b1.reshape(1, -1)
    b2_2d = b2.reshape(1, -1)

    # Batch tiling: tile_b multiple of 8; pad B up to a multiple of tile_b.
    tile_b = min(tile_b, _round_up(B, 8))
    B_pad = _round_up(B, tile_b)
    if B_pad != B:
        s = jnp.pad(s, ((0, B_pad - B), (0, 0)))
    grid = (B_pad // tile_b,)

    batch_map = lambda i: (i, 0)
    const_map = lambda i: (0, 0)

    flops = 2 * B_pad * (state_dim * mid + mid * mid
                         + (2 * mid) * (2 * mid) + (4 * mid) * out_pad)
    bytes_accessed = 4 * (B_pad * state_dim + B_pad * out_pad
                          + int(w0.size) + int(w1.size) + int(w2.size) + int(w3_p.size)
                          + mid + mid + 2 * mid + out_pad)
    cost = pl.CostEstimate(flops=flops, transcendentals=0,
                           bytes_accessed=bytes_accessed)

    q_pad = pl.pallas_call(
        q_network_kernel,
        out_shape=jax.ShapeDtypeStruct((B_pad, out_pad), jnp.float32),
        grid=grid,
        in_specs=[
            pl.BlockSpec((tile_b, state_dim), batch_map),   # s: streamed per batch tile
            pl.BlockSpec(w0.shape, const_map),              # weights/biases: resident
            pl.BlockSpec((1, mid), const_map),
            pl.BlockSpec(w1.shape, const_map),
            pl.BlockSpec((1, mid), const_map),
            pl.BlockSpec(w2.shape, const_map),
            pl.BlockSpec((1, 2 * mid), const_map),
            pl.BlockSpec(w3_p.shape, const_map),
            pl.BlockSpec((1, out_pad), const_map),
        ],
        out_specs=pl.BlockSpec((tile_b, out_pad), batch_map),
        compiler_params=pltpu.CompilerParams(
            dimension_semantics=("parallel",)),
        cost_estimate=cost,
    )(s, w0, b0_2d, w1, b1_2d, w2, b2_2d, w3_p, b3_p)

    q = q_pad[:B, :action_dim]

    if noise_std != 0.0:
        # Matches `q += randn_like(q) * noise_std` (applied outside the kernel).
        assert key is not None, "pass a PRNG key when noise_std != 0"
        q = q + jax.random.normal(key, q.shape, q.dtype) * noise_std
    return q


def init_params(key, state_dim, action_dim, mid_dim):
    """Init mimicking the PyTorch module: default U[-1/sqrt(fan_in), +] for the
    first/last Linear, orthogonal weight + zero bias for the DenseNet linears."""
    k0, kb0, k1, k2, k3, kb3 = jax.random.split(key, 6)

    def uniform_linear(kw, kb, fan_in, fan_out):
        bound = 1.0 / jnp.sqrt(fan_in)
        w = jax.random.uniform(kw, (fan_in, fan_out), jnp.float32, -bound, bound)
        b = jax.random.uniform(kb, (fan_out,), jnp.float32, -bound, bound)
        return w, b

    ortho = jax.nn.initializers.orthogonal(scale=1.0)

    w0, b0 = uniform_linear(k0, kb0, state_dim, mid_dim)
    w1 = ortho(k1, (mid_dim, mid_dim), jnp.float32)
    b1 = jnp.zeros((mid_dim,), jnp.float32)
    w2 = ortho(k2, (2 * mid_dim, 2 * mid_dim), jnp.float32)
    b2 = jnp.zeros((2 * mid_dim,), jnp.float32)
    w3, b3 = uniform_linear(k3, kb3, 4 * mid_dim, action_dim)
    return {"w0": w0, "b0": b0, "w1": w1, "b1": b1,
            "w2": w2, "b2": b2, "w3": w3, "b3": b3}


def reference_forward(s, params):
    """Pure-JAX reference matching the PyTorch module exactly."""
    w3_sn = spectral_normalize(params["w3"])
    h1 = jnp.maximum(s @ params["w0"] + params["b0"], 0.0)
    d1 = _hardswish(h1 @ params["w1"] + params["b1"])
    x2 = jnp.concatenate([h1, d1], axis=1)
    d2 = _hardswish(x2 @ params["w2"] + params["b2"])
    x3 = jnp.concatenate([x2, d2], axis=1)
    return x3 @ w3_sn + params["b3"]


if __name__ == "__main__":
    batch = 2
    state_dim = 16
    action_dim = 4
    mid_dim = 32

    key = jax.random.PRNGKey(0)
    kp, ks = jax.random.split(key)

    params = init_params(kp, state_dim, action_dim, mid_dim)
    s = jax.random.normal(ks, (batch, state_dim), jnp.float32)

    q = q_network_forward(s, params)          # noise_std = 0.0 path
    q = jax.block_until_ready(q)

    q_ref = reference_forward(s, params)
    assert q.shape == (batch, action_dim)
    assert jnp.allclose(q, q_ref, atol=1e-4, rtol=1e-4), "mismatch vs reference"

    print("KERNEL_OK")
</pallas_src>

<mosaic_0001>
module attributes {stable_mosaic.version = 11 : i64} {
  func.func @q_network_kernel(%arg0: i32, %arg1: memref<8x16xf32, #tpu.memory_space<vmem>>, %arg2: memref<16x32xf32, #tpu.memory_space<vmem>>, %arg3: memref<1x32xf32, #tpu.memory_space<vmem>>, %arg4: memref<32x32xf32, #tpu.memory_space<vmem>>, %arg5: memref<1x32xf32, #tpu.memory_space<vmem>>, %arg6: memref<64x64xf32, #tpu.memory_space<vmem>>, %arg7: memref<1x64xf32, #tpu.memory_space<vmem>>, %arg8: memref<128x128xf32, #tpu.memory_space<vmem>>, %arg9: memref<1x128xf32, #tpu.memory_space<vmem>>, %arg10: memref<8x128xf32, #tpu.memory_space<vmem>>) attributes {dimension_semantics = [#tpu.dimension_semantics<parallel>], iteration_bounds = array<i64: 1>, scalar_prefetch = 0 : i64, scratch_operands = 0 : i64, tpu.core_type = #tpu.core_type<tc>, window_params = [{transform_indices = @transform_0, window_bounds = array<i64: 8, 16>}, {pipeline_mode = #tpu.pipeline_mode<synchronous>, transform_indices = @transform_1, window_bounds = array<i64: 16, 32>}, {pipeline_mode = #tpu.pipeline_mode<synchronous>, transform_indices = @transform_2, window_bounds = array<i64: 1, 32>}, {pipeline_mode = #tpu.pipeline_mode<synchronous>, transform_indices = @transform_3, window_bounds = array<i64: 32, 32>}, {pipeline_mode = #tpu.pipeline_mode<synchronous>, transform_indices = @transform_4, window_bounds = array<i64: 1, 32>}, {pipeline_mode = #tpu.pipeline_mode<synchronous>, transform_indices = @transform_5, window_bounds = array<i64: 64, 64>}, {pipeline_mode = #tpu.pipeline_mode<synchronous>, transform_indices = @transform_6, window_bounds = array<i64: 1, 64>}, {pipeline_mode = #tpu.pipeline_mode<synchronous>, transform_indices = @transform_7, window_bounds = array<i64: 128, 128>}, {pipeline_mode = #tpu.pipeline_mode<synchronous>, transform_indices = @transform_8, window_bounds = array<i64: 1, 128>}, {transform_indices = @transform_9, window_bounds = array<i64: 8, 128>}]} {
    %c0 = arith.constant 0 : index
    %c0_0 = arith.constant 0 : index
    %0 = vector.load %arg1[%c0, %c0_0] : memref<8x16xf32, #tpu.memory_space<vmem>>, vector<8x16xf32>
    %c0_1 = arith.constant 0 : index
    %c0_2 = arith.constant 0 : index
    %1 = vector.load %arg2[%c0_1, %c0_2] : memref<16x32xf32, #tpu.memory_space<vmem>>, vector<16x32xf32>
    %cst = arith.constant dense<0.000000e+00> : vector<8x32xf32>
    %2 = tpu.matmul %0, %1, %cst {dimension_numbers = #tpu.dot_dimension_numbers<[1], [0], [0], [1], [0, 0, 1, 1], [], []>} : vector<8x16xf32>, vector<16x32xf32>, vector<8x32xf32> -> vector<8x32xf32>
    %c0_3 = arith.constant 0 : index
    %c0_4 = arith.constant 0 : index
    %3 = vector.load %arg3[%c0_3, %c0_4] : memref<1x32xf32, #tpu.memory_space<vmem>>, vector<1x32xf32>
    %4 = vector.broadcast %3 : vector<1x32xf32> to vector<8x32xf32>
    %5 = arith.addf %2, %4 : vector<8x32xf32>
    %cst_5 = arith.constant 0.000000e+00 : f32
    %6 = vector.broadcast %cst_5 : f32 to vector<8x32xf32>
    %7 = arith.maximumf %5, %6 : vector<8x32xf32>
    %c0_6 = arith.constant 0 : index
    %c0_7 = arith.constant 0 : index
    %8 = vector.load %arg4[%c0_6, %c0_7] : memref<32x32xf32, #tpu.memory_space<vmem>>, vector<32x32xf32>
    %cst_8 = arith.constant dense<0.000000e+00> : vector<8x32xf32>
    %9 = tpu.matmul %7, %8, %cst_8 {dimension_numbers = #tpu.dot_dimension_numbers<[1], [0], [0], [1], [0, 0, 1, 1], [], []>} : vector<8x32xf32>, vector<32x32xf32>, vector<8x32xf32> -> vector<8x32xf32>
    %c0_9 = arith.constant 0 : index
    %c0_10 = arith.constant 0 : index
    %10 = vector.load %arg5[%c0_9, %c0_10] : memref<1x32xf32, #tpu.memory_space<vmem>>, vector<1x32xf32>
    %11 = vector.broadcast %10 : vector<1x32xf32> to vector<8x32xf32>
    %12 = arith.addf %9, %11 : vector<8x32xf32>
    %cst_11 = arith.constant 3.000000e+00 : f32
    %13 = vector.broadcast %cst_11 : f32 to vector<8x32xf32>
    %14 = arith.addf %12, %13 : vector<8x32xf32>
    %cst_12 = arith.constant 0.000000e+00 : f32
    %cst_13 = arith.constant 6.000000e+00 : f32
    %15 = vector.broadcast %cst_12 : f32 to vector<8x32xf32>
    %16 = arith.maximumf %15, %14 : vector<8x32xf32>
    %17 = vector.broadcast %cst_13 : f32 to vector<8x32xf32>
    %18 = arith.minimumf %17, %16 : vector<8x32xf32>
    %cst_14 = arith.constant 0.166666672 : f32
    %19 = vector.broadcast %cst_14 : f32 to vector<8x32xf32>
    %20 = arith.mulf %18, %19 : vector<8x32xf32>
    %21 = arith.mulf %20, %12 : vector<8x32xf32>
    %22 = tpu.concatenate %7, %21 in 1 : vector<8x32xf32>, vector<8x32xf32> -> vector<8x64xf32>
    %c0_15 = arith.constant 0 : index
    %c0_16 = arith.constant 0 : index
    %23 = vector.load %arg6[%c0_15, %c0_16] : memref<64x64xf32, #tpu.memory_space<vmem>>, vector<64x64xf32>
    %cst_17 = arith.constant dense<0.000000e+00> : vector<8x64xf32>
    %24 = tpu.matmul %22, %23, %cst_17 {dimension_numbers = #tpu.dot_dimension_numbers<[1], [0], [0], [1], [0, 0, 1, 1], [], []>} : vector<8x64xf32>, vector<64x64xf32>, vector<8x64xf32> -> vector<8x64xf32>
    %c0_18 = arith.constant 0 : index
    %c0_19 = arith.constant 0 : index
    %25 = vector.load %arg7[%c0_18, %c0_19] : memref<1x64xf32, #tpu.memory_space<vmem>>, vector<1x64xf32>
    %26 = vector.broadcast %25 : vector<1x64xf32> to vector<8x64xf32>
    %27 = arith.addf %24, %26 : vector<8x64xf32>
    %cst_20 = arith.constant 3.000000e+00 : f32
    %28 = vector.broadcast %cst_20 : f32 to vector<8x64xf32>
    %29 = arith.addf %27, %28 : vector<8x64xf32>
    %cst_21 = arith.constant 0.000000e+00 : f32
    %cst_22 = arith.constant 6.000000e+00 : f32
    %30 = vector.broadcast %cst_21 : f32 to vector<8x64xf32>
    %31 = arith.maximumf %30, %29 : vector<8x64xf32>
    %32 = vector.broadcast %cst_22 : f32 to vector<8x64xf32>
    %33 = arith.minimumf %32, %31 : vector<8x64xf32>
    %cst_23 = arith.constant 0.166666672 : f32
    %34 = vector.broadcast %cst_23 : f32 to vector<8x64xf32>
    %35 = arith.mulf %33, %34 : vector<8x64xf32>
    %36 = arith.mulf %35, %27 : vector<8x64xf32>
    %37 = tpu.concatenate %22, %36 in 1 : vector<8x64xf32>, vector<8x64xf32> -> vector<8x128xf32>
    %c0_24 = arith.constant 0 : index
    %c0_25 = arith.constant 0 : index
    %38 = vector.load %arg8[%c0_24, %c0_25] : memref<128x128xf32, #tpu.memory_space<vmem>>, vector<128x128xf32>
    %cst_26 = arith.constant dense<0.000000e+00> : vector<8x128xf32>
    %39 = tpu.matmul %37, %38, %cst_26 {dimension_numbers = #tpu.dot_dimension_numbers<[1], [0], [0], [1], [0, 0, 1, 1], [], []>} : vector<8x128xf32>, vector<128x128xf32>, vector<8x128xf32> -> vector<8x128xf32>
    %c0_27 = arith.constant 0 : index
    %c0_28 = arith.constant 0 : index
    %40 = vector.load %arg9[%c0_27, %c0_28] : memref<1x128xf32, #tpu.memory_space<vmem>>, vector<1x128xf32>
    %41 = vector.broadcast %40 : vector<1x128xf32> to vector<8x128xf32>
    %42 = arith.addf %39, %41 : vector<8x128xf32>
    %c0_29 = arith.constant 0 : index
    %c0_30 = arith.constant 0 : index
    %43 = vector.load %arg10[%c0_29, %c0_30] : memref<8x128xf32, #tpu.memory_space<vmem>>, vector<8x128xf32>
    tpu.vector_store %arg10[%c0_29, %c0_30], %42 {strides = array<i32>} : memref<8x128xf32, #tpu.memory_space<vmem>>, vector<8x128xf32>,
    return
  }
  func.func @transform_0(%arg0: i32) -> (i32, i32) {
    %c0_i32 = arith.constant 0 : i32
    %c0_i32_0 = arith.constant 0 : i32
    return %arg0, %c0_i32 : i32, i32
  }
  func.func @transform_1(%arg0: i32) -> (i32, i32) {
    %c0_i32 = arith.constant 0 : i32
    %c0_i32_0 = arith.constant 0 : i32
    %c0_i32_1 = arith.constant 0 : i32
    return %c0_i32, %c0_i32_0 : i32, i32
  }
  func.func @transform_2(%arg0: i32) -> (i32, i32) {
    %c0_i32 = arith.constant 0 : i32
    %c0_i32_0 = arith.constant 0 : i32
    %c0_i32_1 = arith.constant 0 : i32
    return %c0_i32, %c0_i32_0 : i32, i32
  }
  func.func @transform_3(%arg0: i32) -> (i32, i32) {
    %c0_i32 = arith.constant 0 : i32
    %c0_i32_0 = arith.constant 0 : i32
    %c0_i32_1 = arith.constant 0 : i32
    return %c0_i32, %c0_i32_0 : i32, i32
  }
  func.func @transform_4(%arg0: i32) -> (i32, i32) {
    %c0_i32 = arith.constant 0 : i32
    %c0_i32_0 = arith.constant 0 : i32
    %c0_i32_1 = arith.constant 0 : i32
    return %c0_i32, %c0_i32_0 : i32, i32
  }
  func.func @transform_5(%arg0: i32) -> (i32, i32) {
    %c0_i32 = arith.constant 0 : i32
    %c0_i32_0 = arith.constant 0 : i32
    %c0_i32_1 = arith.constant 0 : i32
    return %c0_i32, %c0_i32_0 : i32, i32
  }
  func.func @transform_6(%arg0: i32) -> (i32, i32) {
    %c0_i32 = arith.constant 0 : i32
    %c0_i32_0 = arith.constant 0 : i32
    %c0_i32_1 = arith.constant 0 : i32
    return %c0_i32, %c0_i32_0 : i32, i32
  }
  func.func @transform_7(%arg0: i32) -> (i32, i32) {
    %c0_i32 = arith.constant 0 : i32
    %c0_i32_0 = arith.constant 0 : i32
    %c0_i32_1 = arith.constant 0 : i32
    return %c0_i32, %c0_i32_0 : i32, i32
  }
  func.func @transform_8(%arg0: i32) -> (i32, i32) {
    %c0_i32 = arith.constant 0 : i32
    %c0_i32_0 = arith.constant 0 : i32
    %c0_i32_1 = arith.constant 0 : i32
    return %c0_i32, %c0_i32_0 : i32, i32
  }
  func.func @transform_9(%arg0: i32) -> (i32, i32) {
    %c0_i32 = arith.constant 0 : i32
    %c0_i32_0 = arith.constant 0 : i32
    return %arg0, %c0_i32 : i32, i32
  }
}

</mosaic_0001>

<bundles_post_ra>
// kernel: tpu_custom_call.1
= control target key start
LH: loop header
LB: loop body
LE: loop exit
PB: predicated region body
PF: predicated region fallthrough
CT: control target
= control target key end

     0   :  { %14 = vsyncpa [#allocation3], 0  ;;  %s982_s0 = inlined_call_operand.hbm [shape: f32[8,16], index: 0, kind: input, shape index: {}]   ;;  %s983_s1 = inlined_call_operand.hbm [shape: f32[16,32], index: 1, kind: input, shape index: {}]   ;;  %s984_s2 = inlined_call_operand.vmem [shape: f32[1,32], index: 2, kind: input, shape index: {}]   ;;  %s985_s3 = inlined_call_operand.hbm [shape: f32[32,32], index: 3, kind: input, shape index: {}]   ;;  %s986_s4 = inlined_call_operand.vmem [shape: f32[1,32], index: 4, kind: input, shape index: {}]   ;;  %s987_s5 = inlined_call_operand.hbm [shape: f32[64,64], index: 5, kind: input, shape index: {}]   ;;  %s988_s6 = inlined_call_operand.vmem [shape: f32[1,64], index: 6, kind: input, shape index: {}]   ;;  %s989_s7 = inlined_call_operand.hbm [shape: f32[128,128], index: 7, kind: input, shape index: {}]   ;;  %s990_s8 = inlined_call_operand.vmem [shape: f32[1,128], index: 8, kind: input, shape index: {}]   ;;  %s991_s9 = inlined_call_operand.hbm [shape: f32[8,128], index: 9, kind: output, shape index: {}]  }
   0x1   :  { %15 = vsyncpa [#allocation6], 0 }
   0x2   :  { %16 = vsyncpa [#allocation9], 0 }
   0x3   :  { %17 = vsyncpa [#allocation4], 0  ;;  %s800_s30 = smov [#allocation5]   ;;  %s660_s13 = scalar_lea.hbm %s983_s1, 256 }
   0x4   :  { %s33_s10 = sshll.u32 %s800_s30, 4  ;;  %p661_p0 = scmp.ne.s32.totalorder %s983_s1, %s660_s13  ;;  %s34_s10 = int_to_ptr.vmem [resolvable:$true] %s33_s10 }
   0x5   :  { %p664_p1 = scmp.lt.u32.totalorder %s660_s13, %s983_s1 }
   0x7   :  { %p666_p2 = pnand %p664_p1, %p661_p0 }
   0x9   :  { %669 = shalt.err (!%p666_p2)
}
   0xa   :  { %s670_s18 = scalar_lea.vmem %s34_s10, 256  ;;  %p675_p4 = scmp.lt.s32.totalorder %s34_s10, %s34_s10 }
   0xb   :  { %p671_p3 = scmp.ne.s32.totalorder %s34_s10, %s670_s18  ;;  %p676_p5 = scmp.lt.s32.totalorder %s670_s18, %s670_s18 }
   0xd   :  { %p677_p6 = por %p676_p5, %p675_p4 }
   0xf   :  { %p678_p7 = pnand %p677_p6, %p671_p3 }
  0x11   :  { %681 = shalt.err (!%p678_p7)
}
  0x12   :  { %s801_s19 = smov 128   ;;  %s802_s20 = smov 8  }
  0x13   :  { %39 = dma.hbm_to_vmem [thread:$0]  %s983_s1, 256, %s34_s10, [#allocation6], %s801_s19, %s801_s19, %s802_s20  }
  0x14   :  { %s803_s23 = smov [#allocation8]   ;;  %s804_s25 = smov [#allocation2]  }
  0x15   :  { %s61_s24 = sshll.u32 %s803_s23, 4  ;;  %s24_s26 = sshll.u32 %s804_s25, 4  ;;  %s62_s24 = int_to_ptr.vmem [resolvable:$true] %s61_s24  ;;  %s25_s26 = int_to_ptr.vmem [resolvable:$true] %s24_s26 }
  0x16   :  { %s682_s29 = scalar_lea.hbm %s987_s5, 1024 }
  0x17   :  { %p683_p8 = scmp.ne.s32.totalorder %s987_s5, %s682_s29  ;;  %p686_p9 = scmp.lt.u32.totalorder %s682_s29, %s987_s5 }
  0x19   :  { %p688_p10 = pnand %p686_p9, %p683_p8 }
  0x1b   :  { %691 = shalt.err (!%p688_p10)
}
  0x1c   :  { %s692_s1 = scalar_lea.vmem %s62_s24, 1024  ;;  %p697_p12 = scmp.lt.s32.totalorder %s62_s24, %s62_s24 }
  0x1d   :  { %p693_p11 = scmp.ne.s32.totalorder %s62_s24, %s692_s1  ;;  %p698_p13 = scmp.lt.s32.totalorder %s692_s1, %s692_s1 }
  0x1f   :  { %p699_p0 = por %p698_p13, %p697_p12 }
  0x21   :  { %p700_p1 = pnand %p699_p0, %p693_p11 }
  0x23   :  { %703 = shalt.err (!%p700_p1)
}
  0x24   :  { %67 = dma.hbm_to_vmem [thread:$0]  %s987_s5, 1024, %s62_s24, [#allocation9], %s801_s19, %s801_s19, %s802_s20  }
  0x25   :  { %s704_s17 = scalar_lea.hbm %s982_s0, 128 }
  0x26   :  { %p705_p2 = scmp.ne.s32.totalorder %s982_s0, %s704_s17  ;;  %p708_p3 = scmp.lt.u32.totalorder %s704_s17, %s982_s0 }
  0x28   :  { %p710_p4 = pnand %p708_p3, %p705_p2 }
  0x2a   :  { %713 = shalt.err (!%p710_p4)
}
  0x2b   :  { %s714_s25 = scalar_lea.vmem %s25_s26, 128  ;;  %p719_p6 = scmp.lt.s32.totalorder %s25_s26, %s25_s26 }
  0x2c   :  { %p715_p5 = scmp.ne.s32.totalorder %s25_s26, %s714_s25  ;;  %p720_p7 = scmp.lt.s32.totalorder %s714_s25, %s714_s25 }
  0x2e   :  { %p721_p8 = por %p720_p7, %p719_p6 }
  0x30   :  { %p722_p9 = pnand %p721_p8, %p715_p5 }
  0x32   :  { %725 = shalt.err (!%p722_p9)
}
  0x33   :  { %27 = dma.hbm_to_vmem [thread:$0]  %s982_s0, 128, %s25_s26, [#allocation3]  }
  0x34   :  { %s805_s27 = smov [#allocation7]   ;;  %s806_s29 = smov [#allocation10]  }
  0x35   :  { %s47_s28 = sshll.u32 %s805_s27, 4  ;;  %s75_s30 = sshll.u32 %s806_s29, 4  ;;  %s48_s28 = int_to_ptr.vmem [resolvable:$true] %s47_s28  ;;  %s76_s30 = int_to_ptr.vmem [resolvable:$true] %s75_s30 }
  0x36   :  { %s726_s13 = scalar_lea.hbm %s985_s3, 512 }
  0x37   :  { %p727_p10 = scmp.ne.s32.totalorder %s985_s3, %s726_s13  ;;  %p730_p11 = scmp.lt.u32.totalorder %s726_s13, %s985_s3 }
  0x39   :  { %p732_p12 = pnand %p730_p11, %p727_p10 }
  0x3b   :  { %735 = shalt.err (!%p732_p12)
}
  0x3c   :  { %s736_s0 = scalar_lea.vmem %s48_s28, 512  ;;  %p741_p0 = scmp.lt.s32.totalorder %s48_s28, %s48_s28 }
  0x3d   :  { %p737_p13 = scmp.ne.s32.totalorder %s48_s28, %s736_s0  ;;  %p742_p1 = scmp.lt.s32.totalorder %s736_s0, %s736_s0 }
  0x3f   :  { %p743_p2 = por %p742_p1, %p741_p0 }
  0x41   :  { %p744_p3 = pnand %p743_p2, %p737_p13 }
  0x43   :  { %747 = shalt.err (!%p744_p3)
}
  0x44   :  { %53 = dma.hbm_to_vmem [thread:$0]  %s985_s3, 512, %s48_s28, [#allocation6], %s801_s19, %s801_s19, %s802_s20  }
  0x45   :  { %s748_s21 = scalar_lea.hbm %s989_s7, 2048 }
  0x46   :  { %p749_p4 = scmp.ne.s32.totalorder %s989_s7, %s748_s21  ;;  %p752_p5 = scmp.lt.u32.totalorder %s748_s21, %s989_s7 }
  0x48   :  { %p754_p6 = pnand %p752_p5, %p749_p4 }
  0x4a   :  { %757 = shalt.err (!%p754_p6)
}
  0x4b   :  { %s758_s24 = scalar_lea.vmem %s76_s30, 2048  ;;  %p763_p8 = scmp.lt.s32.totalorder %s76_s30, %s76_s30 }
  0x4c   :  { %p759_p7 = scmp.ne.s32.totalorder %s76_s30, %s758_s24  ;;  %p764_p9 = scmp.lt.s32.totalorder %s758_s24, %s758_s24 }
  0x4e   :  { %p765_p10 = por %p764_p9, %p763_p8 }
  0x50   :  { %p766_p11 = pnand %p765_p10, %p759_p7 }
  0x52   :  { %769 = shalt.err (!%p766_p11)
}
  0x53   :  { %81 = dma.hbm_to_vmem [thread:$0]  %s989_s7, 2048, %s76_s30, [#allocation9], %s801_s19, %s801_s19, %s802_s20  }
  0x54   :  { %792 = dma.done.wait [#allocation3], 128  }
  0x55   :  { %793 = vsyncadd [#allocation3], 4294967168 }
  0x56   :  { %794 = dma.done.wait [#allocation6], 768  }
  0x57   :  { %795 = vsyncadd [#allocation6], 4294966528 }
  0x58   :  { %796 = dma.done.wait [#allocation9], 3072  }
  0x59   :  { %797 = vsyncadd [#allocation9], 4294964224  ;;  %v807_v0 = vmov 0.0|0.0   ;;  %vm808_vm0 = vmmov 0   ;;  %v809_v1 = vmov 0.0   ;;  %v100_v2 = vld [vmem:[#allocation5] sm:$0xff] }
  0x5a   :  { %602 = vmatprep.subr.bf16.mxu0 %v807_v0  ;;  %534 = vmatprep.mubr.msk.f32.mxu0 %vm808_vm0, %v809_v1  ;;  %v101_v3 = vld [vmem:[#allocation5 + $0x8] sm:$0xff]  ;;  %v184_v5 = vld [vmem:[#allocation7] sm:$0xff]  ;;  %v185_v6 = vld [vmem:[#allocation7 + $0x8] sm:$0xff]  ;;  %vm109_vm1 = vcmask 130048   ;;  %vm195_vm2 = vcmask 261120   ;;  %s810_s28 = smov 32  }
  0x5b   :  { %623 = vmatprep.subr.bf16.mxu1 %v807_v0  ;;  %599 = vmatprep.mubr.msk.f32.mxu1 %vm808_vm0, %v809_v1  ;;  %v603_v4 = vpack.c.bf16 %v101_v3, %v100_v2  ;;  %v99_v7 = vld [vmem:[#allocation2] sm:$0xff]  ;;  %v606_v8 = vpack.c.bf16 %v185_v6, %v184_v5  ;;  %v186_v9 = vld [vmem:[#allocation7 + $0x10] sm:$0xff]  ;;  %v187_v10 = vld [vmem:[#allocation7 + $0x18] sm:$0xff]  ;;  %vm294_vm3 = vcmask 523264   ;;  %s811_s30 = smov 64   ;;  %s812_s13 = smov [#allocation11]  }
  0x5c   :  { %v609_v11 = vpack.c.bf16 %v187_v10, %v186_v9  ;;  %v489_v12 = vld [vmem:[%s984_s2] ss:$0 sm:$0xff]  ;;  %v279_v17 = vld [vmem:[#allocation8] sm:$0xff]  ;;  %v281_v19 = vld [vmem:[#allocation8 + $0x10] sm:$0xff] }
  0x5d   :  { %604 = vmatpush3.bf16.msra.mxu0 %v603_v4  ;;  %v280_v18 = vld [vmem:[#allocation8 + $0x8] sm:$0xff]  ;;  %v282_v21 = vld [vmem:[#allocation8 + $0x18] sm:$0xff]  ;;  %v283_v23 = vld [vmem:[#allocation8 + $0x20] sm:$0xff] }
  0x5e   :  { %605 = vmatprep.subr.bf16.mxu0 %v807_v0  ;;  %v612_v20 = vpack.c.bf16 %v280_v18, %v279_v17  ;;  %v615_v22 = vpack.c.bf16 %v282_v21, %v281_v19  ;;  %v284_v24 = vld [vmem:[#allocation8 + $0x28] sm:$0xff]  ;;  %v285_v26 = vld [vmem:[#allocation8 + $0x30] sm:$0xff]  ;;  %v286_v27 = vld [vmem:[#allocation8 + $0x38] sm:$0xff] }
  0x5f   :  { %v618_v25 = vpack.c.bf16 %v284_v24, %v283_v23  ;;  %v621_v28 = vpack.c.bf16 %v286_v27, %v285_v26  ;;  %v491_v29 = vld [vmem:[%s986_s4] ss:$0 sm:$0xff]  ;;  %v378_v40 = vld [vmem:[#allocation10] sm:$0xff]  ;;  %v380_v42 = vld [vmem:[#allocation10 + $0x10] sm:$0xff] }
  0x60   :  { %535 = vmatmul.mubr.msk.f32.vlgmr.msra.gmra.mrb[0].mxu0 %vm109_vm1, %v99_v7  ;;  %v379_v41 = vld [vmem:[#allocation10 + $0x8] sm:$0xff]  ;;  %v381_v44 = vld [vmem:[#allocation10 + $0x18] sm:$0xff]  ;;  %v382_v46 = vld [vmem:[#allocation10 + $0x20] sm:$0xff] }
  0x61   :  { %607 = vmatpush3.bf16.msra.mxu0 %v606_v8  ;;  %545 = vmatprep.mubr.msk.f32.mxu0 %vm808_vm0, %v809_v1  ;;  %v624_v43 = vpack.c.bf16 %v379_v41, %v378_v40  ;;  %v627_v45 = vpack.c.bf16 %v381_v44, %v380_v42  ;;  %v383_v47 = vld [vmem:[#allocation10 + $0x28] sm:$0xff]  ;;  %v384_v49 = vld [vmem:[#allocation10 + $0x30] sm:$0xff]  ;;  %v385_v50 = vld [vmem:[#allocation10 + $0x38] sm:$0xff] }
  0x62   :  { %608 = vmatprep.subr.bf16.mxu0 %v807_v0  ;;  %v630_v48 = vpack.c.bf16 %v383_v47, %v382_v46  ;;  %v633_v51 = vpack.c.bf16 %v385_v50, %v384_v49  ;;  %v386_v52 = vld [vmem:[#allocation10 + $0x40] sm:$0xff]  ;;  %v387_v53 = vld [vmem:[#allocation10 + $0x48] sm:$0xff]  ;;  %v388_v55 = vld [vmem:[#allocation10 + $0x50] sm:$0xff] }
  0x63   :  { %625 = vmatpush3.bf16.msra.mxu1 %v624_v43  ;;  %v636_v54 = vpack.c.bf16 %v387_v53, %v386_v52  ;;  %v389_v56 = vld [vmem:[#allocation10 + $0x58] sm:$0xff]  ;;  %v390_v58 = vld [vmem:[#allocation10 + $0x60] sm:$0xff]  ;;  %v391_v59 = vld [vmem:[#allocation10 + $0x68] sm:$0xff] }
  0x64   :  { %626 = vmatprep.subr.bf16.mxu1 %v807_v0  ;;  %v639_v57 = vpack.c.bf16 %v389_v56, %v388_v55  ;;  %v642_v60 = vpack.c.bf16 %v391_v59, %v390_v58  ;;  %v392_v61 = vld [vmem:[#allocation10 + $0x70] sm:$0xff]  ;;  %v393_v62 = vld [vmem:[#allocation10 + $0x78] sm:$0xff] }
  0x65   :  { %610 = vmatpush3.bf16.msra.mxu0 %v609_v11  ;;  %v645_v63 = vpack.c.bf16 %v393_v62, %v392_v61 }
  0x66   :  { %611 = vmatprep.subr.bf16.mxu0 %v807_v0 }
  0x67   :  { %628 = vmatpush3.bf16.msra.mxu1 %v627_v45 }
  0x68   :  { %629 = vmatprep.subr.bf16.mxu1 %v807_v0 }
  0x6b   :  { %631 = vmatpush3.bf16.msra.mxu1 %v630_v48 }
  0x6c   :  { %632 = vmatprep.subr.bf16.mxu1 %v807_v0 }
  0x6f   :  { %634 = vmatpush3.bf16.msra.mxu1 %v633_v51 }
  0x70   :  { %635 = vmatprep.subr.bf16.mxu1 %v807_v0 }
  0x73   :  { %637 = vmatpush3.bf16.msra.mxu1 %v636_v54 }
  0x74   :  { %638 = vmatprep.subr.bf16.mxu1 %v807_v0 }
  0x77   :  { %640 = vmatpush3.bf16.msra.mxu1 %v639_v57 }
  0x78   :  { %641 = vmatprep.subr.bf16.mxu1 %v807_v0 }
  0x7b   :  { %643 = vmatpush3.bf16.msra.mxu1 %v642_v60 }
  0x7c   :  { %644 = vmatprep.subr.bf16.mxu1 %v807_v0 }
  0x7f   :  { %646 = vmatpush3.bf16.msra.mxu1 %v645_v63 }
 0x133   :  { %v179_v13 = vpop.f32.mrb[0].mxu0 }
 0x134   :  { %v180_v14 = vadd.f32 %v489_v12, %v179_v13  ;;  %v536_v15 = vpop.f32.mrb[1].mxu0 }
 0x136   :  { %v183_v16 = vmax.f32 %v180_v14, 0.0 }
 0x138   :  { %546 = vmatmul.mubr.msk.f32.vlgmr.msra.gmra.mrb[2].mxu0 %vm195_vm2, %v183_v16 }
 0x139   :  { %564 = vmatprep.mubr.msk.f32.mxu0 %vm808_vm0, %v809_v1  ;;  %613 = vmatpush3.bf16.msra.mxu0 %v612_v20  ;;  %v493_v1 = vld [vmem:[%s988_s6] ss:$0 sm:$0xff]  ;;  %s478_s6 = sshll.u32 %s812_s13, 4  ;;  %s479_s6 = int_to_ptr.vmem [resolvable:$true] %s478_s6 }
 0x13a   :  { %614 = vmatprep.subr.bf16.mxu0 %v807_v0  ;;  %s770_s1 = scalar_lea.vmem %s479_s6, 128  ;;  %p775_p13 = scmp.lt.s32.totalorder %s479_s6, %s479_s6 }
 0x13b   :  { %p771_p12 = scmp.ne.s32.totalorder %s479_s6, %s770_s1  ;;  %p776_p0 = scmp.lt.s32.totalorder %s770_s1, %s770_s1 }
 0x13d   :  { %616 = vmatpush3.bf16.msra.mxu0 %v615_v22  ;;  %p777_p1 = por %p776_p0, %p775_p13 }
 0x13e   :  { %617 = vmatprep.subr.bf16.mxu0 %v807_v0 }
 0x13f   :  { %p778_p2 = pnand %p777_p1, %p771_p12 }
 0x141   :  { %619 = vmatpush3.bf16.msra.mxu0 %v618_v25 }
 0x142   :  { %620 = vmatprep.subr.bf16.mxu0 %v807_v0  ;;  %v495_v0 = vld [vmem:[%s990_s8] ss:$0 sm:$0xff] }
 0x145   :  { %622 = vmatpush3.bf16.msra.mxu0 %v621_v28 }
 0x20b   :  { %v265_v30 = vpop.f32.mrb[2].mxu0 }
 0x20c   :  { %v266_v31 = vadd.f32 %v491_v29, %v265_v30  ;;  %v547_v32 = vpop.f32.mrb[3].mxu0 }
 0x20e   :  { %v269_v33 = vadd.f32 3.0, %v266_v31 }
 0x210   :  { %v270_v34 = vmax.f32 %v269_v33, 0.0 }
 0x212   :  { %v271_v35 = vmin.f32 %v270_v34, 6.0 }
 0x214   :  { %v272_v36 = vmul.f32 0.16666667, %v271_v35 }
 0x216   :  { %v273_v37 = vmul.f32 %v272_v36, %v266_v31 }
 0x218   :  { %275 = vrot.lane.b32.xlu0 %v273_v37, %s810_s28 }
 0x28a   :  { %v276_v38 = vpop.permute.xlu0 %275 }
 0x28b   :  { %v278_v39 = vsel %vm195_vm2, %v183_v16, %v276_v38 }
 0x28c   :  { %565 = vmatmul.mubr.msk.f32.vlgmr.msra.gmra.mrb[4].mxu0 %vm294_vm3, %v278_v39 }
 0x35f   :  { %v364_v2 = vpop.f32.mrb[4].mxu0 }
 0x360   :  { %v365_v3 = vadd.f32 %v493_v1, %v364_v2  ;;  %v566_v4 = vpop.f32.mrb[5].mxu0 }
 0x362   :  { %v368_v5 = vadd.f32 3.0, %v365_v3 }
 0x364   :  { %v369_v6 = vmax.f32 %v368_v5, 0.0 }
 0x366   :  { %v370_v7 = vmin.f32 %v369_v6, 6.0 }
 0x368   :  { %v371_v8 = vmul.f32 0.16666667, %v370_v7 }
 0x36a   :  { %v372_v9 = vmul.f32 %v371_v8, %v365_v3 }
 0x36c   :  { %374 = vrot.lane.b32.xlu0 %v372_v9, %s811_s30 }
 0x3de   :  { %v375_v10 = vpop.permute.xlu0 %374 }
 0x3df   :  { %v377_v11 = vsel %vm294_vm3, %v278_v39, %v375_v10 }
 0x3e0   :  { %600 = vmatmul.mubr.f32.vlgmr.msra.gmra.mrb[0].mxu1 %v377_v11 }
 0x4b3   :  { %v467_v12 = vpop.f32.mrb[0].mxu1 }
 0x4b4   :  { %v468_v13 = vadd.f32 %v495_v0, %v467_v12  ;;  %v601_v14 = vpop.f32.mrb[1].mxu1 }
 0x4b6   :  { %471 = vst [vmem:[#allocation11] sm:$0xff] %v468_v13 }
 0x4b7   :  { %781 = shalt.err (!%p778_p2)
}
 0x4b8   :  { %s782_s15 = scalar_lea.hbm %s991_s9, 128 }
 0x4b9   :  { %p783_p3 = scmp.ne.s32.totalorder %s991_s9, %s782_s15  ;;  %p786_p4 = scmp.lt.u32.totalorder %s782_s15, %s991_s9 }
 0x4bb   :  { %p788_p5 = pnand %p786_p4, %p783_p3 }
 0x4bd   :  { %791 = shalt.err (!%p788_p5)
}
 0x4be   :  { %481 = dma.vmem_to_hbm [thread:$0]  %s479_s6, 128, %s991_s9, [#allocation4]  }
 0x4bf   :  { %798 = dma.done.wait [#allocation4], 128  }
 0x4c0   :  { %799 = vsyncadd [#allocation4], 4294967168 }
 0x4c1   :  { %485 = vsyncpa [#allocation3], 1 }
 0x4c2   :  { %486 = vsyncpa [#allocation6], 1 }
 0x4c3   :  { %487 = vsyncpa [#allocation9], 1 }
 0x4c4   :  { %488 = vsyncpa [#allocation4], 1 }

</bundles_post_ra>
